<compile_context>
chip_gen: v7x
topology: tpu7x:2x2x1
jax: 0.10.0
libtpu: 0.0.40
codegen_flags: <defaults>
</compile_context>

<pallas_src>
import jax
import jax.numpy as jnp
from jax import lax
from jax.experimental import pallas as pl
from jax.experimental.pallas import tpu as pltpu


# ---------------------------------------------------------------------------
# Kernels
# ---------------------------------------------------------------------------
def _accumulate_and_finalize(s, t, out_ref, s_acc, t_acc):
    """s, t: (BN, CB, HW) f32 blocks of the current (batch, channel) tile."""
    k = pl.program_id(1)

    @pl.when(k == 0)
    def _():
        s_acc[...] = jnp.zeros_like(s_acc)
        t_acc[...] = jnp.zeros_like(t_acc)

    # channel reduction of x^2 (sum == mean up to a constant that cancels under L2 norm)
    s_acc[...] += jnp.sum(s * s, axis=1)          # (BN, HW)
    t_acc[...] += jnp.sum(t * t, axis=1)          # (BN, HW)

    @pl.when(k == pl.num_programs(1) - 1)
    def _():
        # F.normalize(x, dim=1, eps=1e-12): x / max(||x||_2, eps)
        #   == x * rsqrt(max(sum(x^2), eps^2))      (rsqrt runs on the EUP slot)
        eps2 = jnp.float32(1e-24)
        s_att = s_acc[...]
        t_att = t_acc[...]
        s_inv = lax.rsqrt(jnp.maximum(jnp.sum(s_att * s_att, axis=-1, keepdims=True), eps2))
        t_inv = lax.rsqrt(jnp.maximum(jnp.sum(t_att * t_att, axis=-1, keepdims=True), eps2))
        d = s_att * s_inv - t_att * t_inv
        # lane-dense per-block output tile; final reduce/divide happens outside the kernel.
        out_ref[...] = jnp.full(out_ref.shape, jnp.sum(d * d), dtype=jnp.float32)


def _att_l2_kernel(s_ref, t_ref, out_ref, s_acc, t_acc):
    _accumulate_and_finalize(s_ref[...].astype(jnp.float32),
                             t_ref[...].astype(jnp.float32),
                             out_ref, s_acc, t_acc)


def _att_l2_kernel_assist(s_ref, a_ref, t_ref, out_ref, s_acc, t_acc):
    s = s_ref[...].astype(jnp.float32) + a_ref[...].astype(jnp.float32)  # fused fs + fa
    _accumulate_and_finalize(s, t_ref[...].astype(jnp.float32), out_ref, s_acc, t_acc)


# ---------------------------------------------------------------------------
# Tiling / wrapper
# ---------------------------------------------------------------------------
def _choose_tiles(n, c, hw, inputs, budget_bytes=20 << 20):
    """Pick (batch_tile, channel_tile) so double-buffered input blocks stay in budget."""
    itembytes = sum(x.dtype.itemsize for x in inputs)
    per_cb_row = 2 * hw * itembytes          # double-buffered bytes per (1 sample x 1 channel)
    full_sample = c * per_cb_row
    if full_sample <= budget_bytes:
        # Full-channel block; tile batch with the largest divisor of n that fits.
        bn = max(1, min(n, budget_bytes // full_sample))
        while n % bn:
            bn -= 1
        return bn, c
    # One sample per block; tile channels (block rule: CB % 8 == 0 or CB == C).
    if c % 8 == 0:
        cands = [d for d in range(8, c + 1, 8)
                 if c % d == 0 and d * per_cb_row <= budget_bytes]
        if cands:
            return 1, max(cands)
        return 1, 8
    # TODO(synk): two-pass HW tiling for maps where even a (1, C, HW) block with C not a
    # multiple of 8 exceeds the VMEM budget; rely on a raised vmem_limit for now.
    return 1, c


def _attention_l2_loss(fs, ft, fa=None):
    """fs, ft[, fa]: (N, C, H, W) feature maps -> scalar L2 loss between normalized attention maps."""
    n, c, h, w = fs.shape
    hw = h * w

    # contiguous reshape only — no dtype upcast in the wrapper (kernel casts on load).
    if fa is not None:
        inputs = [fs.reshape(n, c, hw), fa.reshape(n, c, hw), ft.reshape(n, c, hw)]
        kernel = _att_l2_kernel_assist
    else:
        inputs = [fs.reshape(n, c, hw), ft.reshape(n, c, hw)]
        kernel = _att_l2_kernel

    bn, cb = _choose_tiles(n, c, hw, inputs)
    num_bn, num_cb = n // bn, c // cb

    block_bytes = 2 * bn * cb * hw * sum(x.dtype.itemsize for x in inputs)
    scratch_bytes = 2 * bn * hw * 4
    need = block_bytes + scratch_bytes + (4 << 20)
    vmem_limit = int(max(16 << 20, min(need, 64 << 20)))

    in_spec = pl.BlockSpec((bn, cb, hw), lambda i, k: (i, k, 0))

    partials = pl.pallas_call(
        kernel,
        out_shape=jax.ShapeDtypeStruct((num_bn, 8, 128), jnp.float32),
        grid=(num_bn, num_cb),
        in_specs=[in_spec] * len(inputs),
        out_specs=pl.BlockSpec((1, 8, 128), lambda i, k: (i, 0, 0)),
        scratch_shapes=[pltpu.VMEM((bn, hw), jnp.float32),
                        pltpu.VMEM((bn, hw), jnp.float32)],
        compiler_params=pltpu.CompilerParams(
            dimension_semantics=("parallel", "arbitrary"),
            vmem_limit_bytes=vmem_limit,
        ),
    )(*inputs)

    # mean over the (N, HW) attention-difference tensor.
    return jnp.sum(partials[:, 0, 0]) / jnp.float32(n * hw)


def distillation_attention_l2(student, teacher, assistant=None):
    """Mirrors Distillation.forward for supervision='attention', function='L2', normalize=False."""
    losses = []
    for k, fs in student.items():
        if fs is None:
            continue
        ft = teacher[k] if teacher is not None else None
        if ft is None:
            continue
        fa = assistant[k] if assistant is not None else None
        losses.append(_attention_l2_loss(fs, ft, fa))
    if not losses:
        return jnp.float32(0.0)
    return jnp.sum(jnp.stack(losses))


# ---------------------------------------------------------------------------
# Pure-JAX reference (for a lightweight correctness check)
# ---------------------------------------------------------------------------
def _ref_loss(student, teacher, assistant=None):
    def att(x):
        n = x.shape[0]
        a = jnp.mean(x.astype(jnp.float32) ** 2, axis=1).reshape(n, -1)
        nrm = jnp.maximum(jnp.sqrt(jnp.sum(a * a, axis=1, keepdims=True)), 1e-12)
        return a / nrm

    total = jnp.float32(0.0)
    for k, fs in student.items():
        if fs is None:
            continue
        ft = teacher[k] if teacher is not None else None
        if ft is None:
            continue
        fa = assistant[k] if assistant is not None else None
        if fa is not None:
            fs = fs + fa
        d = att(fs) - att(ft)
        total = total + jnp.mean(d * d)
    return total


if __name__ == "__main__":
    key = jax.random.PRNGKey(0)
    k1, k2, k3, k4, k5 = jax.random.split(key, 5)
    # small shapes: two feature levels, NCHW
    student = {
        "feat1": jax.random.normal(k1, (2, 4, 16, 16), jnp.float32),
        "feat2": jax.random.normal(k2, (2, 8, 8, 8), jnp.float32),
    }
    teacher = {
        "feat1": jax.random.normal(k3, (2, 4, 16, 16), jnp.float32),
        "feat2": jax.random.normal(k4, (2, 8, 8, 8), jnp.float32),
    }

    loss = distillation_attention_l2(student, teacher)
    jax.block_until_ready(loss)
    ref = _ref_loss(student, teacher)
    assert abs(float(loss) - float(ref)) <= 1e-4 * max(1.0, abs(float(ref)))

    # also exercise the fused-assistant path (assistant only provided for feat1)
    assistant = {
        "feat1": jax.random.normal(k5, (2, 4, 16, 16), jnp.float32),
        "feat2": None,
    }
    loss_a = distillation_attention_l2(student, teacher, assistant)
    jax.block_until_ready(loss_a)
    ref_a = _ref_loss(student, teacher, assistant)
    assert abs(float(loss_a) - float(ref_a)) <= 1e-4 * max(1.0, abs(float(ref_a)))

    print("KERNEL_OK")
</pallas_src>

<mosaic_0001>
module attributes {stable_mosaic.version = 11 : i64} {
  func.func @_att_l2_kernel(%arg0: i32, %arg1: i32, %arg2: memref<2x4x256xf32, #tpu.memory_space<vmem>>, %arg3: memref<2x4x256xf32, #tpu.memory_space<vmem>>, %arg4: memref<1x8x128xf32, #tpu.memory_space<vmem>>, %arg5: memref<2x256xf32, #tpu.memory_space<vmem>>, %arg6: memref<2x256xf32, #tpu.memory_space<vmem>>) attributes {dimension_semantics = [#tpu.dimension_semantics<parallel>, #tpu.dimension_semantics<arbitrary>], iteration_bounds = array<i64: 1, 1>, scalar_prefetch = 0 : i64, scratch_operands = 2 : i64, tpu.core_type = #tpu.core_type<tc>, window_params = [{transform_indices = @transform_0, window_bounds = array<i64: 2, 4, 256>}, {transform_indices = @transform_1, window_bounds = array<i64: 2, 4, 256>}, {transform_indices = @transform_2, window_bounds = array<i64: 1, 8, 128>}]} {
    %c0 = arith.constant 0 : index
    %c0_0 = arith.constant 0 : index
    %c0_1 = arith.constant 0 : index
    %0 = vector.load %arg2[%c0, %c0_0, %c0_1] : memref<2x4x256xf32, #tpu.memory_space<vmem>>, vector<2x4x256xf32>
    %c0_2 = arith.constant 0 : index
    %c0_3 = arith.constant 0 : index
    %c0_4 = arith.constant 0 : index
    %1 = vector.load %arg3[%c0_2, %c0_3, %c0_4] : memref<2x4x256xf32, #tpu.memory_space<vmem>>, vector<2x4x256xf32>
    %c0_i32 = arith.constant 0 : i32
    %2 = arith.cmpi eq, %arg1, %c0_i32 : i32
    %3 = arith.extui %2 : i1 to i32
    %c0_i32_5 = arith.constant 0 : i32
    %4 = arith.cmpi ne, %3, %c0_i32_5 : i32
    scf.if %4 {
      %cst_17 = arith.constant 0.000000e+00 : f32
      %18 = vector.broadcast %cst_17 : f32 to vector<2x256xf32>
      %c0_18 = arith.constant 0 : index
      %c0_19 = arith.constant 0 : index
      %19 = vector.load %arg5[%c0_18, %c0_19] : memref<2x256xf32, #tpu.memory_space<vmem>>, vector<2x256xf32>
      tpu.vector_store %arg5[%c0_18, %c0_19], %18 {strides = array<i32>} : memref<2x256xf32, #tpu.memory_space<vmem>>, vector<2x256xf32>,
      %cst_20 = arith.constant 0.000000e+00 : f32
      %20 = vector.broadcast %cst_20 : f32 to vector<2x256xf32>
      %c0_21 = arith.constant 0 : index
      %c0_22 = arith.constant 0 : index
      %21 = vector.load %arg6[%c0_21, %c0_22] : memref<2x256xf32, #tpu.memory_space<vmem>>, vector<2x256xf32>
      tpu.vector_store %arg6[%c0_21, %c0_22], %20 {strides = array<i32>} : memref<2x256xf32, #tpu.memory_space<vmem>>, vector<2x256xf32>,
    } else {
    }
    %c0_6 = arith.constant 0 : index
    %c0_7 = arith.constant 0 : index
    %5 = vector.load %arg5[%c0_6, %c0_7] : memref<2x256xf32, #tpu.memory_space<vmem>>, vector<2x256xf32>
    %6 = arith.mulf %0, %0 : vector<2x4x256xf32>
    %cst = arith.constant dense<0.000000e+00> : vector<2x256xf32>
    %7 = vector.multi_reduction <add>, %6, %cst [1] : vector<2x4x256xf32> to vector<2x256xf32>
    %8 = arith.addf %5, %7 : vector<2x256xf32>
    %c0_8 = arith.constant 0 : index
    %c0_9 = arith.constant 0 : index
    %9 = vector.load %arg5[%c0_8, %c0_9] : memref<2x256xf32, #tpu.memory_space<vmem>>, vector<2x256xf32>
    tpu.vector_store %arg5[%c0_8, %c0_9], %8 {strides = array<i32>} : memref<2x256xf32, #tpu.memory_space<vmem>>, vector<2x256xf32>,
    %c0_10 = arith.constant 0 : index
    %c0_11 = arith.constant 0 : index
    %10 = vector.load %arg6[%c0_10, %c0_11] : memref<2x256xf32, #tpu.memory_space<vmem>>, vector<2x256xf32>
    %11 = arith.mulf %1, %1 : vector<2x4x256xf32>
    %cst_12 = arith.constant dense<0.000000e+00> : vector<2x256xf32>
    %12 = vector.multi_reduction <add>, %11, %cst_12 [1] : vector<2x4x256xf32> to vector<2x256xf32>
    %13 = arith.addf %10, %12 : vector<2x256xf32>
    %c0_13 = arith.constant 0 : index
    %c0_14 = arith.constant 0 : index
    %14 = vector.load %arg6[%c0_13, %c0_14] : memref<2x256xf32, #tpu.memory_space<vmem>>, vector<2x256xf32>
    tpu.vector_store %arg6[%c0_13, %c0_14], %13 {strides = array<i32>} : memref<2x256xf32, #tpu.memory_space<vmem>>, vector<2x256xf32>,
    %c0_i32_15 = arith.constant 0 : i32
    %15 = arith.cmpi eq, %arg1, %c0_i32_15 : i32
    %16 = arith.extui %15 : i1 to i32
    %c0_i32_16 = arith.constant 0 : i32
    %17 = arith.cmpi ne, %16, %c0_i32_16 : i32
    scf.if %17 {
      %c0_17 = arith.constant 0 : index
      %c0_18 = arith.constant 0 : index
      %18 = vector.load %arg5[%c0_17, %c0_18] : memref<2x256xf32, #tpu.memory_space<vmem>>, vector<2x256xf32>
      %c0_19 = arith.constant 0 : index
      %c0_20 = arith.constant 0 : index
      %19 = vector.load %arg6[%c0_19, %c0_20] : memref<2x256xf32, #tpu.memory_space<vmem>>, vector<2x256xf32>
      %20 = arith.mulf %18, %18 : vector<2x256xf32>
      %cst_21 = arith.constant dense<0.000000e+00> : vector<2xf32>
      %21 = vector.multi_reduction <add>, %20, %cst_21 [1] : vector<2x256xf32> to vector<2xf32>
      %22 = vector.shape_cast %21 : vector<2xf32> to vector<2x1xf32>
      %cst_22 = arith.constant 1.000000e-24 : f32
      %23 = vector.broadcast %cst_22 : f32 to vector<2x1xf32>
      %24 = arith.maximumf %22, %23 : vector<2x1xf32>
      %25 = math.rsqrt %24 : vector<2x1xf32>
      %26 = arith.mulf %19, %19 : vector<2x256xf32>
      %cst_23 = arith.constant dense<0.000000e+00> : vector<2xf32>
      %27 = vector.multi_reduction <add>, %26, %cst_23 [1] : vector<2x256xf32> to vector<2xf32>
      %28 = vector.shape_cast %27 : vector<2xf32> to vector<2x1xf32>
      %cst_24 = arith.constant 1.000000e-24 : f32
      %29 = vector.broadcast %cst_24 : f32 to vector<2x1xf32>
      %30 = arith.maximumf %28, %29 : vector<2x1xf32>
      %31 = math.rsqrt %30 : vector<2x1xf32>
      %32 = vector.broadcast %25 : vector<2x1xf32> to vector<2x256xf32>
      %33 = arith.mulf %18, %32 : vector<2x256xf32>
      %34 = vector.broadcast %31 : vector<2x1xf32> to vector<2x256xf32>
      %35 = arith.mulf %19, %34 : vector<2x256xf32>
      %36 = arith.subf %33, %35 : vector<2x256xf32>
      %37 = arith.mulf %36, %36 : vector<2x256xf32>
      %38 = vector.shape_cast %37 : vector<2x256xf32> to vector<1x2x256xf32>
      %cst_25 = arith.constant dense<0.000000e+00> : vector<1xf32>
      %39 = vector.multi_reduction <add>, %38, %cst_25 [1, 2] : vector<1x2x256xf32> to vector<1xf32>
      %40 = vector.shape_cast %39 : vector<1xf32> to vector<1x1x1xf32>
      %41 = vector.extract %40[0, 0, 0] : f32 from vector<1x1x1xf32>
      %42 = vector.broadcast %41 : f32 to vector<1x8x128xf32>
      %c0_26 = arith.constant 0 : index
      %c0_27 = arith.constant 0 : index
      %c0_28 = arith.constant 0 : index
      %43 = vector.load %arg4[%c0_26, %c0_27, %c0_28] : memref<1x8x128xf32, #tpu.memory_space<vmem>>, vector<1x8x128xf32>
      tpu.vector_store %arg4[%c0_26, %c0_27, %c0_28], %42 {strides = array<i32>} : memref<1x8x128xf32, #tpu.memory_space<vmem>>, vector<1x8x128xf32>,
    } else {
    }
    return
  }
  func.func @transform_0(%arg0: i32, %arg1: i32) -> (i32, i32, i32) {
    %c0_i32 = arith.constant 0 : i32
    %c0_i32_0 = arith.constant 0 : i32
    return %arg0, %arg1, %c0_i32 : i32, i32, i32
  }
  func.func @transform_1(%arg0: i32, %arg1: i32) -> (i32, i32, i32) {
    %c0_i32 = arith.constant 0 : i32
    %c0_i32_0 = arith.constant 0 : i32
    return %arg0, %arg1, %c0_i32 : i32, i32, i32
  }
  func.func @transform_2(%arg0: i32, %arg1: i32) -> (i32, i32, i32) {
    %c0_i32 = arith.constant 0 : i32
    %c0_i32_0 = arith.constant 0 : i32
    %c0_i32_1 = arith.constant 0 : i32
    return %arg0, %c0_i32, %c0_i32_0 : i32, i32, i32
  }
}

</mosaic_0001>

<bundles_post_ra>
// kernel: tpu_custom_call.1
= control target key start
LH: loop header
LB: loop body
LE: loop exit
PB: predicated region body
PF: predicated region fallthrough
CT: control target
= control target key end

     0   :  { %7 = vsyncpa [#allocation5], 0  ;;  %s473_s0 = inlined_call_operand.hbm [shape: f32[2,4,256], index: 0, kind: input, shape index: {}]   ;;  %s474_s1 = inlined_call_operand.hbm [shape: f32[2,4,256], index: 1, kind: input, shape index: {}]   ;;  %s475_s2 = inlined_call_operand.hbm [shape: f32[1,8,128], index: 2, kind: output, shape index: {}]  }
   0x1   :  { %8 = vsyncpa [#allocation8], 0 }
   0x2   :  { %9 = vsyncpa [#allocation6], 0  ;;  %s384_s9 = smov [#allocation4]   ;;  %s312_s13 = scalar_lea.hbm %s473_s0, 256 }
   0x3   :  { %s15_s10 = sshll.u32 %s384_s9, 4  ;;  %p313_p0 = scmp.ne.s32.totalorder %s473_s0, %s312_s13  ;;  %s16_s10 = int_to_ptr.vmem [resolvable:$true] %s15_s10 }
   0x4   :  { %p316_p1 = scmp.lt.u32.totalorder %s312_s13, %s473_s0 }
   0x6   :  { %p318_p2 = pnand %p316_p1, %p313_p0 }
   0x8   :  { %321 = shalt.err (!%p318_p2)
}
   0x9   :  { %s322_s18 = scalar_lea.vmem %s16_s10, 256  ;;  %p327_p4 = scmp.lt.s32.totalorder %s16_s10, %s16_s10 }
   0xa   :  { %p323_p3 = scmp.ne.s32.totalorder %s16_s10, %s322_s18  ;;  %p328_p5 = scmp.lt.s32.totalorder %s322_s18, %s322_s18 }
   0xc   :  { %p329_p6 = por %p328_p5, %p327_p4 }
   0xe   :  { %p330_p7 = pnand %p329_p6, %p323_p3 }
  0x10   :  { %333 = shalt.err (!%p330_p7)
}
  0x11   :  { %s385_s19 = smov 128   ;;  %s386_s20 = smov 8  }
  0x12   :  { %21 = dma.hbm_to_vmem [thread:$0]  %s473_s0, 256, %s16_s10, [#allocation5], %s385_s19, %s385_s19, %s386_s20  }
  0x13   :  { %s387_s23 = smov [#allocation7]   ;;  %s334_s27 = scalar_lea.hbm %s474_s1, 256 }
  0x14   :  { %s27_s24 = sshll.u32 %s387_s23, 4  ;;  %p335_p8 = scmp.ne.s32.totalorder %s474_s1, %s334_s27  ;;  %s28_s24 = int_to_ptr.vmem [resolvable:$true] %s27_s24 }
  0x15   :  { %p338_p9 = scmp.lt.u32.totalorder %s334_s27, %s474_s1 }
  0x17   :  { %p340_p10 = pnand %p338_p9, %p335_p8 }
  0x19   :  { %343 = shalt.err (!%p340_p10)
}
  0x1a   :  { %s344_s4 = scalar_lea.vmem %s28_s24, 256  ;;  %p349_p12 = scmp.lt.s32.totalorder %s28_s24, %s28_s24 }
  0x1b   :  { %p345_p11 = scmp.ne.s32.totalorder %s28_s24, %s344_s4  ;;  %p350_p13 = scmp.lt.s32.totalorder %s344_s4, %s344_s4 }
  0x1d   :  { %p351_p0 = por %p350_p13, %p349_p12 }
  0x1f   :  { %p352_p1 = pnand %p351_p0, %p345_p11 }
  0x21   :  { %355 = shalt.err (!%p352_p1)
}
  0x22   :  { %33 = dma.hbm_to_vmem [thread:$0]  %s474_s1, 256, %s28_s24, [#allocation8], %s385_s19, %s385_s19, %s386_s20  }
  0x23   :  { %378 = dma.done.wait [#allocation5], 256  }
  0x24   :  { %379 = vsyncadd [#allocation5], 4294967040 }
  0x25   :  { %380 = dma.done.wait [#allocation8], 256  }
  0x26   :  { %381 = vsyncadd [#allocation8], 4294967040  ;;  %v388_v0 = vmov 0.0   ;;  %v389_v1 = vmov 1983009808   ;;  %v96_v3 = vlaneseq  ;;  %v40_v4 = vld [vmem:[#allocation4] sm:$0xff] }
  0x27   :  { %48 = vst [vmem:[#allocation2] sm:$0xf] %v388_v0  ;;  %49 = vst [vmem:[#allocation3] sm:$0xf] %v388_v0  ;;  %v431_v2 = vunpack.c.l.s4 %v389_v1  ;;  %v41_v5 = vld [vmem:[#allocation4 + $0x8] sm:$0xff]  ;;  %v42_v6 = vld [vmem:[#allocation7] sm:$0xff]  ;;  %v51_v8 = vmul.f32 %v40_v4, %v40_v4 }
  0x28   :  { %vm59_vm0 = vcmask 1043456   ;;  %v43_v7 = vld [vmem:[#allocation7 + $0x8] sm:$0xff]  ;;  %v52_v9 = vmul.f32 %v41_v5, %v41_v5  ;;  %v125_v10 = vmul.f32 %v42_v6, %v42_v6  ;;  %v434_v12 = vshrl.u32 %v96_v3, 7  ;;  %s391_s1 = smov [#allocation9]  }
  0x29   :  { %v95_v11 = vunpack.c.0.s8 %v431_v2  ;;  %v126_v13 = vmul.f32 %v43_v7, %v43_v7  ;;  %v55_v14 = vcombine.high %v51_v8, %v51_v8  ;;  %v60_v16 = vsel %vm59_vm0, %v51_v8, 0.0  ;;  %s288_s6 = sshll.u32 %s391_s1, 4  ;;  %s289_s6 = int_to_ptr.vmem [resolvable:$true] %s288_s6 }
  0x2a   :  { %v56_v15 = vcombine.high %v52_v9, %v52_v9  ;;  %v74_v17 = vsel %vm59_vm0, %v52_v9, 0.0  ;;  %v61_v18 = vrot.slane %v60_v16, 4  ;;  %v129_v20 = vcombine.high %v125_v10, %v125_v10  ;;  %s356_s8 = scalar_lea.vmem %s289_s6, 128  ;;  %p361_p3 = scmp.lt.s32.totalorder %s289_s6, %s289_s6 }
  0x2b   :  { %v75_v19 = vrot.slane %v74_v17, 4  ;;  %v130_v21 = vcombine.high %v126_v13, %v126_v13  ;;  %v67_v22 = vsel %vm59_vm0, %v55_v14, 0.0  ;;  %v133_v24 = vsel %vm59_vm0, %v125_v10, 0.0  ;;  %p357_p2 = scmp.ne.s32.totalorder %s289_s6, %s356_s8  ;;  %p362_p4 = scmp.lt.s32.totalorder %s356_s8, %s356_s8 }
  0x2c   :  { %v81_v23 = vsel %vm59_vm0, %v56_v15, 0.0  ;;  %v147_v25 = vsel %vm59_vm0, %v126_v13, 0.0  ;;  %v62_v26 = vadd.f32 %v61_v18, %v60_v16  ;;  %v68_v27 = vrot.slane %v67_v22, 4 }
  0x2d   :  { %v76_v28 = vadd.f32 %v75_v19, %v74_v17  ;;  %v82_v29 = vrot.slane %v81_v23, 4  ;;  %v134_v30 = vrot.slane %v133_v24, 4  ;;  %v140_v31 = vsel %vm59_vm0, %v129_v20, 0.0  ;;  %p363_p5 = por %p362_p4, %p361_p3 }
  0x2e   :  { %v148_v32 = vrot.slane %v147_v25, 4  ;;  %v154_v33 = vsel %vm59_vm0, %v130_v21, 0.0  ;;  %v63_v34 = vrot.slane %v62_v26, 2  ;;  %v69_v35 = vadd.f32 %v68_v27, %v67_v22  ;;  %v50_v22 = vld [vmem:[#allocation2] sm:$0xf] }
  0x2f   :  { %v77_v36 = vrot.slane %v76_v28, 2  ;;  %v83_v37 = vadd.f32 %v82_v29, %v81_v23  ;;  %v135_v38 = vadd.f32 %v134_v30, %v133_v24  ;;  %v141_v39 = vrot.slane %v140_v31, 4  ;;  %v124_v29 = vld [vmem:[#allocation3] sm:$0xf]  ;;  %p364_p6 = pnand %p363_p5, %p357_p2 }
  0x30   :  { %v149_v40 = vadd.f32 %v148_v32, %v147_v25  ;;  %v155_v41 = vrot.slane %v154_v33, 4  ;;  %v64_v42 = vadd.f32 %v63_v34, %v62_v26  ;;  %v70_v43 = vrot.slane %v69_v35, 2 }
  0x31   :  { %v78_v44 = vadd.f32 %v77_v36, %v76_v28  ;;  %v84_v45 = vrot.slane %v83_v37, 2  ;;  %v136_v46 = vrot.slane %v135_v38, 2  ;;  %v142_v47 = vadd.f32 %v141_v39, %v140_v31 }
  0x32   :  { %v150_v48 = vrot.slane %v149_v40, 2  ;;  %v156_v49 = vadd.f32 %v155_v41, %v154_v33  ;;  %v65_v50 = vrot.slane %v64_v42, 1  ;;  %v71_v51 = vadd.f32 %v70_v43, %v69_v35 }
  0x33   :  { %v79_v52 = vrot.slane %v78_v44, 1  ;;  %v85_v53 = vadd.f32 %v84_v45, %v83_v37  ;;  %v137_v54 = vadd.f32 %v136_v46, %v135_v38  ;;  %v143_v55 = vrot.slane %v142_v47, 2 }
  0x34   :  { %v151_v56 = vadd.f32 %v150_v48, %v149_v40  ;;  %v157_v57 = vrot.slane %v156_v49, 2  ;;  %v66_v58 = vadd.f32 %v65_v50, %v64_v42  ;;  %v72_v59 = vrot.slane %v71_v51, 1 }
  0x35   :  { %v80_v60 = vadd.f32 %v79_v52, %v78_v44  ;;  %v86_v61 = vrot.slane %v85_v53, 1  ;;  %v138_v62 = vrot.slane %v137_v54, 1  ;;  %v144_v63 = vadd.f32 %v143_v55, %v142_v47 }
  0x36   :  { %v152_v0 = vrot.slane %v151_v56, 1  ;;  %v158_v1 = vadd.f32 %v157_v57, %v156_v49  ;;  %v73_v2 = vadd.f32 %v72_v59, %v71_v51  ;;  %v445_v4 = vsub.s32 %v95_v11, %v434_v12 }
  0x37   :  { %v87_v3 = vadd.f32 %v86_v61, %v85_v53  ;;  %v139_v5 = vadd.f32 %v138_v62, %v137_v54  ;;  %v145_v6 = vrot.slane %v144_v63, 1  ;;  %vm113_vm1 = vcmask 1041409  }
  0x38   :  { %v153_v7 = vadd.f32 %v152_v0, %v151_v56  ;;  %v159_v8 = vrot.slane %v158_v1, 1  ;;  %v92_v9 = vcombine.low %v66_v58, %v73_v2  ;;  %vm115_vm2 = vcmask 1043459  }
  0x39   :  { %v100_v10 = vcombine.low %v80_v60, %v87_v3  ;;  %v146_v13 = vadd.f32 %v145_v6, %v144_v63  ;;  %vm117_vm3 = vcmask 1045509   ;;  %vm119_vm4 = vcmask 1047559  }
  0x3a   :  { %v160_v14 = vadd.f32 %v159_v8, %v158_v1  ;;  %v99_v15 = vrot.slane %v92_v9, %v445_v4  ;;  %vm208_vm5 = vcmask 1041408   ;;  %v390_v51 = vmov 269488144  }
  0x3b   :  { %v107_v16 = vrot.slane %v100_v10, %v445_v4  ;;  %v165_v17 = vcombine.low %v139_v5, %v146_v13  ;;  %v237_v52 = vunpack.c.l.s4 %v390_v51 }
  0x3c   :  { %v173_v18 = vcombine.low %v153_v7, %v160_v14 }
  0x3d   :  { %v112_v19 = vrot.slane %v107_v16, 7  ;;  %v172_v11 = vrot.slane %v165_v17, %v445_v4  ;;  %v238_v54 = vunpack.c.0.s8 %v237_v52 }
  0x3e   :  { %v180_v20 = vrot.slane %v173_v18, %v445_v4 }
  0x3f   :  { %v114_v21 = vsel %vm113_vm1, %v112_v19, %v99_v15  ;;  %v241_v55 = vsub.s32 %v238_v54, %v434_v12 }
  0x40   :  { %v116_v23 = vsel %vm115_vm2, %v112_v19, %v114_v21  ;;  %v183_v24 = vrot.slane %v180_v20, 7 }
  0x41   :  { %v118_v25 = vsel %vm117_vm3, %v112_v19, %v116_v23 }
  0x42   :  { %v120_v26 = vsel %vm119_vm4, %v112_v19, %v118_v25  ;;  %v184_v27 = vsel %vm113_vm1, %v183_v24, %v172_v11 }
  0x43   :  { %v122_v28 = vadd.f32 %v120_v26, %v50_v22  ;;  %v185_v30 = vsel %vm115_vm2, %v183_v24, %v184_v27 }
  0x44   :  { %v186_v31 = vsel %vm117_vm3, %v183_v24, %v185_v30 }
  0x45   :  { %123 = vst [vmem:[#allocation2] sm:$0xf] %v122_v28  ;;  %v187_v32 = vsel %vm119_vm4, %v183_v24, %v186_v31 }
  0x46   :  { %v189_v33 = vadd.f32 %v187_v32, %v124_v29 }
  0x48   :  { %190 = vst [vmem:[#allocation3] sm:$0xf] %v189_v33 }
  0x4c   :  { %v194_v34 = vld [vmem:[#allocation2] sm:$0xf] }
  0x4d   :  { %v196_v35 = vmul.f32 %v194_v34, %v194_v34 }
  0x4f   :  { %v204_v36 = vrot.slane %v196_v35, %v445_v4  ;;  %v195_v37 = vld [vmem:[#allocation3] sm:$0xf] }
  0x50   :  { %v216_v38 = vmul.f32 %v195_v37, %v195_v37 }
  0x51   :  { %v205_v39 = vcombine.high %v204_v36, %v204_v36  ;;  %v209_v40 = vsel %vm208_vm5, %v204_v36, 0.0 }
  0x52   :  { %v224_v41 = vrot.slane %v216_v38, %v445_v4 }
  0x53   :  { %v210_v42 = vsel %vm208_vm5, %v205_v39, 0.0 }
  0x54   :  { %v211_v43 = vadd.f32 %v210_v42, %v209_v40  ;;  %v225_v44 = vcombine.high %v224_v41, %v224_v41  ;;  %v228_v45 = vsel %vm208_vm5, %v224_v41, 0.0 }
  0x56   :  { %212 = vadd.xlane.f32.xlu0 %v211_v43  ;;  %v229_v46 = vsel %vm208_vm5, %v225_v44, 0.0 }
  0x57   :  { %v230_v47 = vadd.f32 %v229_v46, %v228_v45 }
  0x5a   :  { %231 = vadd.xlane.f32.xlu0 %v230_v47 }
  0xe3   :  { %v213_v48 = vpop.xlane.xlu0 %212 }
  0xe4   :  { %v214_v49 = vmax.f32 %v213_v48, 1e-24 }
  0xe6   :  { %308 = vrsqrt.f32 %v214_v49 }
  0xe7   :  { %v232_v50 = vpop.xlane.xlu0 %231 }
  0xe8   :  { %v233_v53 = vmax.f32 %v232_v50, 1e-24 }
  0xea   :  { %310 = vrsqrt.f32 %v233_v53 }
  0xf0   :  { %v309_v56 = vpop.eup %308 }
  0xf1   :  { %v242_v57 = vrot.slane %v309_v56, %v241_v55 }
  0xf3   :  { %v244_v60 = vmul.f32 %v242_v57, %v194_v34 }
  0xf4   :  { %v311_v58 = vpop.eup %310 }
  0xf5   :  { %v252_v59 = vrot.slane %v311_v58, %v241_v55 }
  0xf7   :  { %v254_v61 = vmul.f32 %v252_v59, %v195_v37 }
  0xf9   :  { %v255_v62 = vsub.f32 %v244_v60, %v254_v61 }
  0xfb   :  { %v256_v63 = vmul.f32 %v255_v62, %v255_v62 }
  0xfd   :  { %v264_v0 = vrot.slane %v256_v63, %v445_v4 }
  0xff   :  { %v265_v1 = vcombine.high %v264_v0, %v264_v0  ;;  %v268_v2 = vsel %vm208_vm5, %v264_v0, 0.0 }
 0x101   :  { %v269_v3 = vsel %vm208_vm5, %v265_v1, 0.0 }
 0x102   :  { %v270_v5 = vadd.f32 %v269_v3, %v268_v2 }
 0x104   :  { %271 = vadd.xlane.f32.xlu1 %v270_v5 }
 0x191   :  { %v272_v6 = vpop.xlane.xlu1 %271 }
 0x192   :  { %v273_v7 = vrot.slane %v272_v6, 4 }
 0x194   :  { %v274_v12 = vadd.f32 %v273_v7, %v272_v6 }
 0x196   :  { %v275_v8 = vrot.slane %v274_v12, 2 }
 0x198   :  { %v276_v9 = vadd.f32 %v275_v8, %v274_v12 }
 0x19a   :  { %v277_v10 = vrot.slane %v276_v9, 1 }
 0x19c   :  { %v278_v13 = vadd.f32 %v277_v10, %v276_v9 }
 0x19e   :  { %298 = vpush %v278_v13 }
 0x1cf   :  { %s299_s7 = spop %298 }
 0x1d0   :  { %v280_v4 = vstv %s299_s7 }
 0x1d1   :  { %281 = vst [vmem:[#allocation9] sm:$0xff] %v280_v4 }
 0x1d2   :  { %367 = shalt.err (!%p364_p6)
}
 0x1d3   :  { %s368_s11 = scalar_lea.hbm %s475_s2, 128 }
 0x1d4   :  { %p369_p7 = scmp.ne.s32.totalorder %s475_s2, %s368_s11  ;;  %p372_p8 = scmp.lt.u32.totalorder %s368_s11, %s475_s2 }
 0x1d6   :  { %p374_p9 = pnand %p372_p8, %p369_p7 }
 0x1d8   :  { %377 = shalt.err (!%p374_p9)
}
 0x1d9   :  { %291 = dma.vmem_to_hbm [thread:$0]  %s289_s6, 128, %s475_s2, [#allocation6]  }
 0x1da   :  { %382 = dma.done.wait [#allocation6], 128  }
 0x1db   :  { %383 = vsyncadd [#allocation6], 4294967168 }
 0x1dc   :  { %295 = vsyncpa [#allocation5], 1 }
 0x1dd   :  { %296 = vsyncpa [#allocation8], 1 }
 0x1de   :  { %297 = vsyncpa [#allocation6], 1 }

</bundles_post_ra>
